<compile_context>
chip_gen: v6e
topology: v6e:2x2x1
jax: 0.10.0
libtpu: 0.0.40
codegen_flags: <defaults>
</compile_context>

<pallas_src>
import numpy as np
import jax
import jax.numpy as jnp
from jax.experimental import pallas as pl
from jax.experimental.pallas import tpu as pltpu

_HIDDEN = 128          # fc0/fc1 width; also the padded output width of fc2/fc3
_FC2_OUT = 64          # true fc2 output width (zero-padded to _HIDDEN in the kernel)


def _round_up(x, m):
    return (x + m - 1) // m * m


def _choose_tile_b(bs):
    """Batch tile: multiple of 16 (bf16 sublane packing), >=2 grid steps when
    bs allows it (v7x dual TensorCore + software pipelining), capped at 512."""
    bs16 = _round_up(bs, 16)
    if bs16 <= 16:
        return bs16
    return min(512, _round_up(pl.cdiv(bs16, 2), 16))


def _mlp_kernel(x_ref,
                w0_ref, b0_ref,
                w1_ref, b1_ref,
                w2_ref, b2_ref,
                w3_ref, b3_ref,
                out_ref):
    """Full forward pass for one (tile_b, d0_pad) batch tile.

    Weights are bf16 (MXU-native), biases f32, accumulation f32.  The
    activation is carried as a local value (no VMEM scratch round-trips).
    """
    # fc0: single lane-dense matmul (padded input lanes hit zero weight rows).
    h = jnp.dot(x_ref[...], w0_ref[...], preferred_element_type=jnp.float32)
    h = jnp.maximum(h + b0_ref[...], 0.0)

    # fc1 applied three times with shared weights (as in the PyTorch forward).
    # Keep the three dots back-to-back so w1 can stay staged in the MXU;
    # hoist the bias broadcast (JAX does not CSE broadcast_in_dim).
    w1 = w1_ref[...]
    b1 = jnp.broadcast_to(b1_ref[...], h.shape)
    for _ in range(3):
        h = jnp.maximum(
            jnp.dot(h.astype(jnp.bfloat16), w1,
                    preferred_element_type=jnp.float32) + b1, 0.0)

    # fc2 (zero-padded 128 -> 128) + ReLU.  Padded columns stay exactly 0.
    h = jnp.maximum(
        jnp.dot(h.astype(jnp.bfloat16), w2_ref[...],
                preferred_element_type=jnp.float32) + b2_ref[...], 0.0)

    # fc3 (zero-padded 128 -> 128) + tanh; lane-dense (tile_b, 128) f32 store.
    out_ref[...] = jnp.tanh(
        jnp.dot(h.astype(jnp.bfloat16), w3_ref[...],
                preferred_element_type=jnp.float32) + b3_ref[...])


@jax.jit
def gamma_linear_deep_nonconv_forward(state, u, prepped):
    """
    args:
        state:   (bs, traj_len, n_state)   float32
        u:       (bs, traj_len, m_control) float32
        prepped: kernel-layout params from prepare_params()
    returns:
        gamma: (bs, m_control) float32
    """
    bs, traj_len, n_state = state.shape
    m_control = u.shape[2]

    # Flatten the two contiguous streams (free reshapes), concatenate, and
    # zero-pad the feature dim to the prepared w0 row count (multiple of 128).
    xs = state.reshape(bs, traj_len * n_state).astype(jnp.float32)
    xu = u.reshape(bs, traj_len * m_control).astype(jnp.float32)
    x = jnp.concatenate([xs, xu], axis=1)
    din0 = x.shape[1]
    d0_pad = prepped["w0"].shape[0]

    # Batch tile + zero-pad bs to a multiple of tile_b (finite pad rows,
    # sliced off below).  Cast the streamed input to bf16 (halves x DMA bytes).
    tile_b = _choose_tile_b(bs)
    bs_pad = _round_up(bs, tile_b)
    x = jnp.pad(x, ((0, bs_pad - bs), (0, d0_pad - din0))).astype(jnp.bfloat16)
    grid = (bs_pad // tile_b,)

    pinned = lambda i: (0, 0)          # weights/biases resident across the grid
    stream = lambda i: (i, 0)          # batch-streamed blocks

    flops = 2 * bs_pad * _HIDDEN * (d0_pad + 5 * _HIDDEN)
    transcendentals = bs_pad * _HIDDEN
    bytes_accessed = (2 * bs_pad * d0_pad                       # x  (bf16)
                      + 4 * bs_pad * _HIDDEN                    # out (f32)
                      + 2 * (d0_pad + 3 * _HIDDEN) * _HIDDEN    # weights (bf16)
                      + 4 * 4 * _HIDDEN)                        # biases (f32)

    out = pl.pallas_call(
        _mlp_kernel,
        out_shape=jax.ShapeDtypeStruct((bs_pad, _HIDDEN), jnp.float32),
        grid=grid,
        in_specs=[
            pl.BlockSpec((tile_b, d0_pad), stream),        # x (bf16)
            pl.BlockSpec((d0_pad, _HIDDEN), pinned),       # w0 (padded, bf16)
            pl.BlockSpec((1, _HIDDEN), pinned),            # b0
            pl.BlockSpec((_HIDDEN, _HIDDEN), pinned),      # w1 (bf16)
            pl.BlockSpec((1, _HIDDEN), pinned),            # b1
            pl.BlockSpec((_HIDDEN, _HIDDEN), pinned),      # w2 (padded, bf16)
            pl.BlockSpec((1, _HIDDEN), pinned),            # b2 (padded)
            pl.BlockSpec((_HIDDEN, _HIDDEN), pinned),      # w3 (padded, bf16)
            pl.BlockSpec((1, _HIDDEN), pinned),            # b3 (padded)
        ],
        out_specs=pl.BlockSpec((tile_b, _HIDDEN), stream),
        compiler_params=pltpu.CompilerParams(
            dimension_semantics=("parallel",),
            vmem_limit_bytes=8 * 1024 * 1024,
        ),
        cost_estimate=pl.CostEstimate(
            flops=flops,
            transcendentals=transcendentals,
            bytes_accessed=bytes_accessed,
        ),
    )(
        x,
        prepped["w0"], prepped["b0"],
        prepped["w1"], prepped["b1"],
        prepped["w2"], prepped["b2"],
        prepped["w3"], prepped["b3"],
    )
    # Drop padded batch rows and zero-padded output columns.
    return out[:bs, :m_control]


def prepare_params(params, n_state, m_control, traj_len):
    """One-time re-layout of PyTorch-shaped params into kernel layout.

    - w0's rows are permuted into (all-state | all-u) order to match the
      wrapper's un-interleaved concat, then zero-padded to a multiple of 128
      rows so fc0 is one lane-dense K-padded matmul (exact: pad rows are 0).
    - fc2/fc3 are zero-padded to 128 output columns (fc3 also to 128 input
      rows) for lane-dense MXU matmuls and stores.
    - Weights are cast to bf16 (MXU-native); biases stay f32.
    """
    step = n_state + m_control
    t = np.arange(traj_len)[:, None]
    state_rows = (t * step + np.arange(n_state)[None, :]).reshape(-1)
    u_rows = (t * step + n_state + np.arange(m_control)[None, :]).reshape(-1)

    w0 = np.asarray(params["w0"])
    w0_perm = np.concatenate([w0[state_rows], w0[u_rows]], axis=0)
    din0 = w0_perm.shape[0]
    d0_pad = _round_up(din0, 128)

    pad2 = _HIDDEN - _FC2_OUT
    pad3 = _HIDDEN - m_control
    return {
        "w0": jnp.asarray(
            np.pad(w0_perm, ((0, d0_pad - din0), (0, 0)))).astype(jnp.bfloat16),
        "b0": jnp.asarray(params["b0"], jnp.float32),
        "w1": jnp.asarray(params["w1"]).astype(jnp.bfloat16),
        "b1": jnp.asarray(params["b1"], jnp.float32),
        "w2": jnp.pad(jnp.asarray(params["w2"]),
                      ((0, 0), (0, pad2))).astype(jnp.bfloat16),
        "b2": jnp.pad(jnp.asarray(params["b2"], jnp.float32), ((0, 0), (0, pad2))),
        "w3": jnp.pad(jnp.asarray(params["w3"]),
                      ((0, pad2), (0, pad3))).astype(jnp.bfloat16),
        "b3": jnp.pad(jnp.asarray(params["b3"], jnp.float32), ((0, 0), (0, pad3))),
    }


def init_params(key, n_state, m_control, traj_len):
    """Synthetic init matching nn.Linear shapes (weights stored as (in, out))."""
    in0 = (n_state + m_control) * traj_len
    dims = [(in0, _HIDDEN), (_HIDDEN, _HIDDEN), (_HIDDEN, _FC2_OUT),
            (_FC2_OUT, m_control)]
    params = {}
    for i, (din, dout) in enumerate(dims):
        key, kw, kb = jax.random.split(key, 3)
        bound = 1.0 / float(np.sqrt(din))
        params[f"w{i}"] = jax.random.uniform(
            kw, (din, dout), jnp.float32, minval=-bound, maxval=bound)
        params[f"b{i}"] = jax.random.uniform(
            kb, (1, dout), jnp.float32, minval=-bound, maxval=bound)
    return params


def _reference_forward(state, u, params):
    """Pure-JAX f32 reference identical to the PyTorch forward."""
    x = jnp.concatenate([state, u], axis=-1)
    x = x.reshape(x.shape[0], -1)
    h = jax.nn.relu(x @ params["w0"] + params["b0"])
    for _ in range(3):
        h = jax.nn.relu(h @ params["w1"] + params["b1"])
    h = jax.nn.relu(h @ params["w2"] + params["b2"])
    return jnp.tanh(h @ params["w3"] + params["b3"])


if __name__ == "__main__":
    # Small shapes consistent with the module's forward signature.
    bs, traj_len, n_state, m_control = 64, 8, 4, 2

    key = jax.random.PRNGKey(0)
    k_params, k_state, k_u = jax.random.split(key, 3)

    params = init_params(k_params, n_state, m_control, traj_len)
    prepped = prepare_params(params, n_state, m_control, traj_len)

    state = jax.random.normal(k_state, (bs, traj_len, n_state), jnp.float32)
    u = jax.random.normal(k_u, (bs, traj_len, m_control), jnp.float32)

    gamma = gamma_linear_deep_nonconv_forward(state, u, prepped)
    gamma = jax.block_until_ready(gamma)

    ref = _reference_forward(state, u, params)
    assert gamma.shape == (bs, m_control)
    # bf16 MXU path vs. f32 reference: loose but meaningful tolerance.
    assert jnp.allclose(gamma, ref, atol=5e-2, rtol=5e-2), float(
        jnp.max(jnp.abs(gamma - ref)))

    print("KERNEL_OK")
</pallas_src>

<mosaic_0001>
module attributes {stable_mosaic.version = 11 : i64} {
  func.func @_mlp_kernel(%arg0: i32, %arg1: memref<32x128xbf16, #tpu.memory_space<vmem>>, %arg2: memref<128x128xbf16, #tpu.memory_space<vmem>>, %arg3: memref<1x128xf32, #tpu.memory_space<vmem>>, %arg4: memref<128x128xbf16, #tpu.memory_space<vmem>>, %arg5: memref<1x128xf32, #tpu.memory_space<vmem>>, %arg6: memref<128x128xbf16, #tpu.memory_space<vmem>>, %arg7: memref<1x128xf32, #tpu.memory_space<vmem>>, %arg8: memref<128x128xbf16, #tpu.memory_space<vmem>>, %arg9: memref<1x128xf32, #tpu.memory_space<vmem>>, %arg10: memref<32x128xf32, #tpu.memory_space<vmem>>) attributes {dimension_semantics = [#tpu.dimension_semantics<parallel>], iteration_bounds = array<i64: 2>, scalar_prefetch = 0 : i64, scratch_operands = 0 : i64, tpu.core_type = #tpu.core_type<tc>, window_params = [{transform_indices = @transform_0, window_bounds = array<i64: 32, 128>}, {pipeline_mode = #tpu.pipeline_mode<synchronous>, transform_indices = @transform_1, window_bounds = array<i64: 128, 128>}, {pipeline_mode = #tpu.pipeline_mode<synchronous>, transform_indices = @transform_2, window_bounds = array<i64: 1, 128>}, {pipeline_mode = #tpu.pipeline_mode<synchronous>, transform_indices = @transform_3, window_bounds = array<i64: 128, 128>}, {pipeline_mode = #tpu.pipeline_mode<synchronous>, transform_indices = @transform_4, window_bounds = array<i64: 1, 128>}, {pipeline_mode = #tpu.pipeline_mode<synchronous>, transform_indices = @transform_5, window_bounds = array<i64: 128, 128>}, {pipeline_mode = #tpu.pipeline_mode<synchronous>, transform_indices = @transform_6, window_bounds = array<i64: 1, 128>}, {pipeline_mode = #tpu.pipeline_mode<synchronous>, transform_indices = @transform_7, window_bounds = array<i64: 128, 128>}, {pipeline_mode = #tpu.pipeline_mode<synchronous>, transform_indices = @transform_8, window_bounds = array<i64: 1, 128>}, {transform_indices = @transform_9, window_bounds = array<i64: 32, 128>}]} {
    %c0 = arith.constant 0 : index
    %c0_0 = arith.constant 0 : index
    %0 = vector.load %arg1[%c0, %c0_0] : memref<32x128xbf16, #tpu.memory_space<vmem>>, vector<32x128xbf16>
    %c0_1 = arith.constant 0 : index
    %c0_2 = arith.constant 0 : index
    %1 = vector.load %arg2[%c0_1, %c0_2] : memref<128x128xbf16, #tpu.memory_space<vmem>>, vector<128x128xbf16>
    %cst = arith.constant dense<0.000000e+00> : vector<32x128xf32>
    %2 = tpu.matmul %0, %1, %cst {dimension_numbers = #tpu.dot_dimension_numbers<[1], [0], [0], [1], [0, 0, 1, 1], [], []>} : vector<32x128xbf16>, vector<128x128xbf16>, vector<32x128xf32> -> vector<32x128xf32>
    %c0_3 = arith.constant 0 : index
    %c0_4 = arith.constant 0 : index
    %3 = vector.load %arg3[%c0_3, %c0_4] : memref<1x128xf32, #tpu.memory_space<vmem>>, vector<1x128xf32>
    %4 = vector.broadcast %3 : vector<1x128xf32> to vector<32x128xf32>
    %5 = arith.addf %2, %4 : vector<32x128xf32>
    %cst_5 = arith.constant 0.000000e+00 : f32
    %6 = vector.broadcast %cst_5 : f32 to vector<32x128xf32>
    %7 = arith.maximumf %5, %6 : vector<32x128xf32>
    %c0_6 = arith.constant 0 : index
    %c0_7 = arith.constant 0 : index
    %8 = vector.load %arg4[%c0_6, %c0_7] : memref<128x128xbf16, #tpu.memory_space<vmem>>, vector<128x128xbf16>
    %c0_8 = arith.constant 0 : index
    %c0_9 = arith.constant 0 : index
    %9 = vector.load %arg5[%c0_8, %c0_9] : memref<1x128xf32, #tpu.memory_space<vmem>>, vector<1x128xf32>
    %10 = vector.shape_cast %9 : vector<1x128xf32> to vector<1x128xf32>
    %11 = vector.broadcast %10 : vector<1x128xf32> to vector<32x128xf32>
    %12 = arith.truncf %7 : vector<32x128xf32> to vector<32x128xbf16>
    %cst_10 = arith.constant dense<0.000000e+00> : vector<32x128xf32>
    %13 = tpu.matmul %12, %8, %cst_10 {dimension_numbers = #tpu.dot_dimension_numbers<[1], [0], [0], [1], [0, 0, 1, 1], [], []>} : vector<32x128xbf16>, vector<128x128xbf16>, vector<32x128xf32> -> vector<32x128xf32>
    %14 = arith.addf %13, %11 : vector<32x128xf32>
    %cst_11 = arith.constant 0.000000e+00 : f32
    %15 = vector.broadcast %cst_11 : f32 to vector<32x128xf32>
    %16 = arith.maximumf %14, %15 : vector<32x128xf32>
    %17 = arith.truncf %16 : vector<32x128xf32> to vector<32x128xbf16>
    %cst_12 = arith.constant dense<0.000000e+00> : vector<32x128xf32>
    %18 = tpu.matmul %17, %8, %cst_12 {dimension_numbers = #tpu.dot_dimension_numbers<[1], [0], [0], [1], [0, 0, 1, 1], [], []>} : vector<32x128xbf16>, vector<128x128xbf16>, vector<32x128xf32> -> vector<32x128xf32>
    %19 = arith.addf %18, %11 : vector<32x128xf32>
    %cst_13 = arith.constant 0.000000e+00 : f32
    %20 = vector.broadcast %cst_13 : f32 to vector<32x128xf32>
    %21 = arith.maximumf %19, %20 : vector<32x128xf32>
    %22 = arith.truncf %21 : vector<32x128xf32> to vector<32x128xbf16>
    %cst_14 = arith.constant dense<0.000000e+00> : vector<32x128xf32>
    %23 = tpu.matmul %22, %8, %cst_14 {dimension_numbers = #tpu.dot_dimension_numbers<[1], [0], [0], [1], [0, 0, 1, 1], [], []>} : vector<32x128xbf16>, vector<128x128xbf16>, vector<32x128xf32> -> vector<32x128xf32>
    %24 = arith.addf %23, %11 : vector<32x128xf32>
    %cst_15 = arith.constant 0.000000e+00 : f32
    %25 = vector.broadcast %cst_15 : f32 to vector<32x128xf32>
    %26 = arith.maximumf %24, %25 : vector<32x128xf32>
    %27 = arith.truncf %26 : vector<32x128xf32> to vector<32x128xbf16>
    %c0_16 = arith.constant 0 : index
    %c0_17 = arith.constant 0 : index
    %28 = vector.load %arg6[%c0_16, %c0_17] : memref<128x128xbf16, #tpu.memory_space<vmem>>, vector<128x128xbf16>
    %cst_18 = arith.constant dense<0.000000e+00> : vector<32x128xf32>
    %29 = tpu.matmul %27, %28, %cst_18 {dimension_numbers = #tpu.dot_dimension_numbers<[1], [0], [0], [1], [0, 0, 1, 1], [], []>} : vector<32x128xbf16>, vector<128x128xbf16>, vector<32x128xf32> -> vector<32x128xf32>
    %c0_19 = arith.constant 0 : index
    %c0_20 = arith.constant 0 : index
    %30 = vector.load %arg7[%c0_19, %c0_20] : memref<1x128xf32, #tpu.memory_space<vmem>>, vector<1x128xf32>
    %31 = vector.broadcast %30 : vector<1x128xf32> to vector<32x128xf32>
    %32 = arith.addf %29, %31 : vector<32x128xf32>
    %cst_21 = arith.constant 0.000000e+00 : f32
    %33 = vector.broadcast %cst_21 : f32 to vector<32x128xf32>
    %34 = arith.maximumf %32, %33 : vector<32x128xf32>
    %35 = arith.truncf %34 : vector<32x128xf32> to vector<32x128xbf16>
    %c0_22 = arith.constant 0 : index
    %c0_23 = arith.constant 0 : index
    %36 = vector.load %arg8[%c0_22, %c0_23] : memref<128x128xbf16, #tpu.memory_space<vmem>>, vector<128x128xbf16>
    %cst_24 = arith.constant dense<0.000000e+00> : vector<32x128xf32>
    %37 = tpu.matmul %35, %36, %cst_24 {dimension_numbers = #tpu.dot_dimension_numbers<[1], [0], [0], [1], [0, 0, 1, 1], [], []>} : vector<32x128xbf16>, vector<128x128xbf16>, vector<32x128xf32> -> vector<32x128xf32>
    %c0_25 = arith.constant 0 : index
    %c0_26 = arith.constant 0 : index
    %38 = vector.load %arg9[%c0_25, %c0_26] : memref<1x128xf32, #tpu.memory_space<vmem>>, vector<1x128xf32>
    %39 = vector.broadcast %38 : vector<1x128xf32> to vector<32x128xf32>
    %40 = arith.addf %37, %39 : vector<32x128xf32>
    %41 = math.tanh %40 : vector<32x128xf32>
    %c0_27 = arith.constant 0 : index
    %c0_28 = arith.constant 0 : index
    %42 = vector.load %arg10[%c0_27, %c0_28] : memref<32x128xf32, #tpu.memory_space<vmem>>, vector<32x128xf32>
    tpu.vector_store %arg10[%c0_27, %c0_28], %41 {strides = array<i32>} : memref<32x128xf32, #tpu.memory_space<vmem>>, vector<32x128xf32>,
    return
  }
  func.func @transform_0(%arg0: i32) -> (i32, i32) {
    %c0_i32 = arith.constant 0 : i32
    %c0_i32_0 = arith.constant 0 : i32
    return %arg0, %c0_i32 : i32, i32
  }
  func.func @transform_1(%arg0: i32) -> (i32, i32) {
    %c0_i32 = arith.constant 0 : i32
    %c0_i32_0 = arith.constant 0 : i32
    %c0_i32_1 = arith.constant 0 : i32
    return %c0_i32, %c0_i32_0 : i32, i32
  }
  func.func @transform_2(%arg0: i32) -> (i32, i32) {
    %c0_i32 = arith.constant 0 : i32
    %c0_i32_0 = arith.constant 0 : i32
    %c0_i32_1 = arith.constant 0 : i32
    return %c0_i32, %c0_i32_0 : i32, i32
  }
  func.func @transform_3(%arg0: i32) -> (i32, i32) {
    %c0_i32 = arith.constant 0 : i32
    %c0_i32_0 = arith.constant 0 : i32
    %c0_i32_1 = arith.constant 0 : i32
    return %c0_i32, %c0_i32_0 : i32, i32
  }
  func.func @transform_4(%arg0: i32) -> (i32, i32) {
    %c0_i32 = arith.constant 0 : i32
    %c0_i32_0 = arith.constant 0 : i32
    %c0_i32_1 = arith.constant 0 : i32
    return %c0_i32, %c0_i32_0 : i32, i32
  }
  func.func @transform_5(%arg0: i32) -> (i32, i32) {
    %c0_i32 = arith.constant 0 : i32
    %c0_i32_0 = arith.constant 0 : i32
    %c0_i32_1 = arith.constant 0 : i32
    return %c0_i32, %c0_i32_0 : i32, i32
  }
  func.func @transform_6(%arg0: i32) -> (i32, i32) {
    %c0_i32 = arith.constant 0 : i32
    %c0_i32_0 = arith.constant 0 : i32
    %c0_i32_1 = arith.constant 0 : i32
    return %c0_i32, %c0_i32_0 : i32, i32
  }
  func.func @transform_7(%arg0: i32) -> (i32, i32) {
    %c0_i32 = arith.constant 0 : i32
    %c0_i32_0 = arith.constant 0 : i32
    %c0_i32_1 = arith.constant 0 : i32
    return %c0_i32, %c0_i32_0 : i32, i32
  }
  func.func @transform_8(%arg0: i32) -> (i32, i32) {
    %c0_i32 = arith.constant 0 : i32
    %c0_i32_0 = arith.constant 0 : i32
    %c0_i32_1 = arith.constant 0 : i32
    return %c0_i32, %c0_i32_0 : i32, i32
  }
  func.func @transform_9(%arg0: i32) -> (i32, i32) {
    %c0_i32 = arith.constant 0 : i32
    %c0_i32_0 = arith.constant 0 : i32
    return %arg0, %c0_i32 : i32, i32
  }
}

</mosaic_0001>

<bundles_post_ra>
// kernel: gamma_linear_deep_nonconv_forward.1
= control target key start
LH: loop header
LB: loop body
LE: loop exit
PB: predicated region body
PF: predicated region fallthrough
CT: control target
= control target key end

     0   :  { %s1362_s30 = smov 0   ;;  %s1549_s0 = inlined_call_operand.vmem [shape: bf16[64,128], index: 0, kind: input, shape index: {}]   ;;  %s1550_s1 = inlined_call_operand.vmem [shape: bf16[128,128], index: 1, kind: input, shape index: {}]   ;;  %s1551_s2 = inlined_call_operand.vmem [shape: f32[1,128], index: 2, kind: input, shape index: {}]   ;;  %s1552_s3 = inlined_call_operand.vmem [shape: bf16[128,128], index: 3, kind: input, shape index: {}]   ;;  %s1553_s4 = inlined_call_operand.vmem [shape: f32[1,128], index: 4, kind: input, shape index: {}]   ;;  %s1554_s5 = inlined_call_operand.vmem [shape: bf16[128,128], index: 5, kind: input, shape index: {}]   ;;  %s1555_s6 = inlined_call_operand.vmem [shape: f32[1,128], index: 6, kind: input, shape index: {}]   ;;  %s1556_s7 = inlined_call_operand.vmem [shape: bf16[128,128], index: 7, kind: input, shape index: {}]   ;;  %s1557_s8 = inlined_call_operand.vmem [shape: f32[1,128], index: 8, kind: input, shape index: {}]   ;;  %s1558_s9 = inlined_call_operand.vmem [shape: f32[64,128], index: 9, kind: output, shape index: {}]  }
   0x1 LB: > { %s1025_s10 = sadd.s32 4294967295, %s1310_s30   ;;  %p1029_p0 = scmp.ge.s32.totalorder %s1310_s30, 1  ;;  %s1310_s30 = sphi %s1362_s30, %s19_s30  }
   0x2   : > { %p288_p1 = scmp.lt.s32.totalorder %s1310_s30, 3 }
   0x4   : > { %p289_p2 = pnand %p1029_p0, %p288_p1 }
   0x5   : > { %s1030_s13 = sshll.u32 (!%p289_p2), %s1025_s10, 2 }
   0x6   : > { %292 = sbr.rel (%p289_p2) target bundleno = 1292 (0x50c), region = 56  ;;  %p325_p3 = scmp.lt.s32.totalorder (!%p289_p2), %s1030_s13, 7 }
   0xb   : > { %v1262_v0 = vld [vmem:[%s1550_s1 + $0x38] sm:$0xff]   ;;  %v1263_v1 = vld [vmem:[%s1550_s1 + $0x30] sm:$0xff]   ;;  %s1560_s13 = smov (!%p325_p3, %s1030_s13), 7  ;;  %v1264_v2 = vld [vmem:[%s1550_s1 + $0x28] sm:$0xff]  }
   0xc   : > { %1134 = vmatprep.subr.bf16.mxu0 %v1262_v0  ;;  %s1031_s18 = sshll.u32 %s1560_s13, 2  ;;  %v1265_v3 = vld [vmem:[%s1550_s1 + $0x20] sm:$0xff]   ;;  %v1394_v5 = vld [vmem:[%s1552_s3 + $0x38] sm:$0xff]   ;;  %v1399_v6 = vld [vmem:[%s1552_s3 + $0x30] sm:$0xff]   ;;  %s1033_s11 = sshll.u32 %s1560_s13, 3 }
   0xd   : > { %1135 = vmatpush3.bf16.msra.mxu0 %v1262_v0  ;;  %s1385_s21 = scalar_lea.vmem %s1549_s0, %s1031_s18  ;;  %v1266_v7 = vld [vmem:[%s1550_s1 + $0x18] sm:$0xff]   ;;  %1154 = vmatprep.subr.bf16.mxu1 %v1394_v5  ;;  %v1267_v8 = vld [vmem:[%s1550_s1 + $0x10] sm:$0xff]   ;;  %v1413_v9 = vld [vmem:[%s1552_s3 + $0x28] sm:$0xff]   ;;  %s334_s15 = scalar_lea.vmem %s1558_s9, %s1033_s11 }
   0xe   : > { %1136 = vmatprep.subr.bf16.mxu0 %v1263_v1  ;;  %v1270_v4 = vld [vmem:[%s1385_s21] sm:$0xff]   ;;  %1155 = vmatpush3.bf16.msra.mxu1 %v1394_v5  ;;  %v1268_v11 = vld [vmem:[%s1550_s1 + $0x8] sm:$0xff]   ;;  %v1428_v12 = vld [vmem:[%s1552_s3 + $0x18] sm:$0xff]  }
   0xf   : > { %1150 = vmatprep.mubr.bf16.mxu0 %v1270_v4  ;;  %1156 = vmatprep.subr.bf16.mxu1 %v1399_v6  ;;  %v1418_v10 = vld [vmem:[%s1552_s3 + $0x20] sm:$0xff]   ;;  %v1271_v14 = vld [vmem:[%s1385_s21 + $0x8] sm:$0xff]   ;;  %v1277_v15 = vld [vmem:[%s1552_s3 + $0x10] sm:$0xff]  }
  0x10   : > { %v1269_v13 = vld [vmem:[%s1550_s1] sm:$0xff]   ;;  %v1278_v16 = vld [vmem:[%s1552_s3 + $0x8] sm:$0xff]   ;;  %v1280_v48 = vld [vmem:[%s1554_s5 + $0x38] sm:$0xff]  }
  0x11   : > { %1137 = vmatpush3.bf16.msra.mxu0 %v1263_v1  ;;  %v1279_v17 = vld [vmem:[%s1552_s3] sm:$0xff]   ;;  %v1281_v49 = vld [vmem:[%s1554_s5 + $0x30] sm:$0xff]   ;;  %v1282_v50 = vld [vmem:[%s1554_s5 + $0x28] sm:$0xff]  }
  0x12   : > { %1138 = vmatprep.subr.bf16.mxu0 %v1264_v2  ;;  %1157 = vmatpush3.bf16.msra.mxu1 %v1399_v6  ;;  %v1034_v20 = vld [vmem:[%s1551_s2] ss:$0 sm:$0xff]  ;;  %v1284_v52 = vld [vmem:[%s1554_s5 + $0x18] sm:$0xff]   ;;  %v1286_v4 = vld [vmem:[%s1554_s5 + $0x8] sm:$0xff]  }
  0x13   : > { %1158 = vmatprep.subr.bf16.mxu1 %v1413_v9  ;;  %v1474_v35 = vld [vmem:[%s1553_s4] ss:$0 sm:$0xff] }
  0x14   : > { %v1283_v51 = vld [vmem:[%s1554_s5 + $0x20] sm:$0xff]  }
  0x15   : > { %1139 = vmatpush3.bf16.msra.mxu0 %v1264_v2 }
  0x16   : > { %1140 = vmatprep.subr.bf16.mxu0 %v1265_v3  ;;  %1159 = vmatpush3.bf16.msra.mxu1 %v1413_v9 }
  0x17   : > { %1160 = vmatprep.subr.bf16.mxu1 %v1418_v10 }
  0x19   : > { %1141 = vmatpush3.bf16.msra.mxu0 %v1265_v3  ;;  %v1285_v3 = vld [vmem:[%s1554_s5 + $0x10] sm:$0xff]  }
  0x1a   : > { %1142 = vmatprep.subr.bf16.mxu0 %v1266_v7  ;;  %1161 = vmatpush3.bf16.msra.mxu1 %v1418_v10 }
  0x1b   : > { %1162 = vmatprep.subr.bf16.mxu1 %v1428_v12 }
  0x1d   : > { %1143 = vmatpush3.bf16.msra.mxu0 %v1266_v7  ;;  %v1289_v7 = vld [vmem:[%s1556_s7 + $0x30] sm:$0xff]  }
  0x1e   : > { %1144 = vmatprep.subr.bf16.mxu0 %v1267_v8  ;;  %1163 = vmatpush3.bf16.msra.mxu1 %v1428_v12 }
  0x1f   : > { %1164 = vmatprep.subr.bf16.mxu1 %v1277_v15 }
  0x21   : > { %1145 = vmatpush3.bf16.msra.mxu0 %v1267_v8  ;;  %v1290_v8 = vld [vmem:[%s1556_s7 + $0x28] sm:$0xff]  }
  0x22   : > { %1146 = vmatprep.subr.bf16.mxu0 %v1268_v11  ;;  %1165 = vmatpush3.bf16.msra.mxu1 %v1277_v15 }
  0x23   : > { %1166 = vmatprep.subr.bf16.mxu1 %v1278_v16 }
  0x25   : > { %1147 = vmatpush3.bf16.msra.mxu0 %v1268_v11 }
  0x26   : > { %1148 = vmatprep.subr.bf16.mxu0 %v1269_v13  ;;  %1167 = vmatpush3.bf16.msra.mxu1 %v1278_v16 }
  0x27   : > { %1168 = vmatprep.subr.bf16.mxu1 %v1279_v17 }
  0x29   : > { %1149 = vmatpush3.bf16.msra.mxu0 %v1269_v13 }
  0x2a   : > { %1174 = vmatprep.subr.bf16.mxu0 %v1394_v5  ;;  %1169 = vmatpush3.bf16.msra.mxu1 %v1279_v17 }
  0x2b   : > { %1194 = vmatprep.subr.bf16.mxu1 %v1394_v5 }
  0x2c   : > { %1151 = vmatmul.mubr.bf16.vlgmr.msra.gmra.mxu0 %v1271_v14 }
  0x2d   : > { %1175 = vmatpush3.bf16.msra.mxu0 %v1394_v5 }
  0x2e   : > { %1176 = vmatprep.subr.bf16.mxu0 %v1399_v6 }
  0x31   : > { %1177 = vmatpush3.bf16.msra.mxu0 %v1399_v6 }
  0x32   : > { %1178 = vmatprep.subr.bf16.mxu0 %v1413_v9 }
  0x35   : > { %1179 = vmatpush3.bf16.msra.mxu0 %v1413_v9 }
  0x36   : > { %1180 = vmatprep.subr.bf16.mxu0 %v1418_v10 }
  0x39   : > { %1181 = vmatpush3.bf16.msra.mxu0 %v1418_v10 }
  0x3a   : > { %1182 = vmatprep.subr.bf16.mxu0 %v1428_v12 }
  0x3d   : > { %1183 = vmatpush3.bf16.msra.mxu0 %v1428_v12 }
  0x3e   : > { %1184 = vmatprep.subr.bf16.mxu0 %v1277_v15 }
  0x41   : > { %1185 = vmatpush3.bf16.msra.mxu0 %v1277_v15 }
  0x42   : > { %1186 = vmatprep.subr.bf16.mxu0 %v1278_v16 }
  0x45   : > { %1187 = vmatpush3.bf16.msra.mxu0 %v1278_v16 }
  0x46   : > { %1188 = vmatprep.subr.bf16.mxu0 %v1279_v17 }
  0x49   : > { %1189 = vmatpush3.bf16.msra.mxu0 %v1279_v17 }
  0x4a   : > { %1214 = vmatprep.subr.bf16.mxu0 %v1280_v48 }
  0xec   : > { %v1152_v18 = vpop.f32.mrf.mxu0 }
  0xed   : > { %v467_v24 = vadd.f32 %v1152_v18, %v1034_v20 }
  0xee   : > { %v458_v19 = vpop.f32.mrf.mxu0 }
  0xef   : > { %v459_v22 = vadd.f32 %v1034_v20, %v458_v19  ;;  %v475_v30 = vmax.f32 %v467_v24, 0.0 }
  0xf0   : > { %v1153_v21 = vpop.f32.mrf.mxu0 }
  0xf1   : > { %v470_v23 = vadd.f32 %v1153_v21, %v1034_v20  ;;  %v473_v28 = vmax.f32 %v459_v22, 0.0 }
  0xf2   : > { %v461_v25 = vpop.f32.mrf.mxu0 }
  0xf3   : > { %v462_v26 = vadd.f32 %v1034_v20, %v461_v25  ;;  %v476_v27 = vmax.f32 %v470_v23, 0.0  ;;  %v1293_v25 = vld [vmem:[%s1556_s7 + $0x10] sm:$0xff]  }
  0xf5   : > { %v474_v29 = vmax.f32 %v462_v26, 0.0  ;;  %v501_v32 = vpack.c.bf16 %v476_v27, %v475_v30  ;;  %v1294_v26 = vld [vmem:[%s1556_s7 + $0x8] sm:$0xff]   ;;  %v1295_v27 = vld [vmem:[%s1556_s7] sm:$0xff]  }
  0xf6   : > { %v1054_v30 = vld [vmem:[%s1555_s6] ss:$0 sm:$0xff] }
  0xf7   : > { %v500_v31 = vpack.c.bf16 %v474_v29, %v473_v28 }
  0xf9   : > { %1170 = vmatprep.mubr.bf16.mxu1 %v500_v31 }
  0xfa   : > { %1171 = vmatmul.mubr.bf16.vlgmr.msra.gmra.mxu1 %v501_v32 }
  0xfb   : > { %1195 = vmatpush3.bf16.msra.mxu1 %v1394_v5  ;;  %v1287_v5 = vld [vmem:[%s1554_s5] sm:$0xff]  }
  0xfc   : > { %1196 = vmatprep.subr.bf16.mxu1 %v1399_v6 }
  0xff   : > { %1197 = vmatpush3.bf16.msra.mxu1 %v1399_v6  ;;  %v1288_v6 = vld [vmem:[%s1556_s7 + $0x38] sm:$0xff]  }
 0x100   : > { %1198 = vmatprep.subr.bf16.mxu1 %v1413_v9 }
 0x103   : > { %1199 = vmatpush3.bf16.msra.mxu1 %v1413_v9  ;;  %v1291_v9 = vld [vmem:[%s1556_s7 + $0x20] sm:$0xff]  }
 0x104   : > { %1200 = vmatprep.subr.bf16.mxu1 %v1418_v10 }
 0x107   : > { %1201 = vmatpush3.bf16.msra.mxu1 %v1418_v10  ;;  %v1292_v10 = vld [vmem:[%s1556_s7 + $0x18] sm:$0xff]  }
 0x108   : > { %1202 = vmatprep.subr.bf16.mxu1 %v1428_v12 }
 0x10b   : > { %1203 = vmatpush3.bf16.msra.mxu1 %v1428_v12 }
 0x10c   : > { %1204 = vmatprep.subr.bf16.mxu1 %v1277_v15 }
 0x10f   : > { %1205 = vmatpush3.bf16.msra.mxu1 %v1277_v15 }
 0x110   : > { %1206 = vmatprep.subr.bf16.mxu1 %v1278_v16 }
 0x113   : > { %1207 = vmatpush3.bf16.msra.mxu1 %v1278_v16 }
 0x114   : > { %1208 = vmatprep.subr.bf16.mxu1 %v1279_v17 }
 0x117   : > { %1209 = vmatpush3.bf16.msra.mxu1 %v1279_v17 }
 0x118   : > { %1234 = vmatprep.subr.bf16.mxu1 %v1288_v6 }
 0x1ba   : > { %v1172_v33 = vpop.f32.mrf.mxu1 }
 0x1bb   : > { %v593_v39 = vadd.f32 %v1172_v33, %v1474_v35 }
 0x1bc   : > { %v584_v34 = vpop.f32.mrf.mxu1 }
 0x1bd   : > { %v585_v37 = vadd.f32 %v1474_v35, %v584_v34  ;;  %v601_v45 = vmax.f32 %v593_v39, 0.0 }
 0x1be   : > { %v1173_v36 = vpop.f32.mrf.mxu1 }
 0x1bf   : > { %v596_v38 = vadd.f32 %v1173_v36, %v1474_v35  ;;  %v599_v43 = vmax.f32 %v585_v37, 0.0 }
 0x1c0   : > { %v587_v40 = vpop.f32.mrf.mxu1 }
 0x1c1   : > { %v588_v41 = vadd.f32 %v1474_v35, %v587_v40  ;;  %v602_v42 = vmax.f32 %v596_v38, 0.0 }
 0x1c3   : > { %v600_v44 = vmax.f32 %v588_v41, 0.0  ;;  %v604_v47 = vpack.c.bf16 %v602_v42, %v601_v45 }
 0x1c5   : > { %v603_v46 = vpack.c.bf16 %v600_v44, %v599_v43  ;;  %v1063_v44 = vld [vmem:[%s1557_s8] ss:$0 sm:$0xff] }
 0x1c7   : > { %1190 = vmatprep.mubr.bf16.mxu0 %v603_v46 }
 0x1c8   : > { %1191 = vmatmul.mubr.bf16.vlgmr.msra.gmra.mxu0 %v604_v47 }
 0x1c9   : > { %1215 = vmatpush3.bf16.msra.mxu0 %v1280_v48 }
 0x1ca   : > { %1216 = vmatprep.subr.bf16.mxu0 %v1281_v49 }
 0x1cd   : > { %1217 = vmatpush3.bf16.msra.mxu0 %v1281_v49 }
 0x1ce   : > { %1218 = vmatprep.subr.bf16.mxu0 %v1282_v50 }
 0x1d1   : > { %1219 = vmatpush3.bf16.msra.mxu0 %v1282_v50 }
 0x1d2   : > { %1220 = vmatprep.subr.bf16.mxu0 %v1283_v51 }
 0x1d5   : > { %1221 = vmatpush3.bf16.msra.mxu0 %v1283_v51 }
 0x1d6   : > { %1222 = vmatprep.subr.bf16.mxu0 %v1284_v52 }
 0x1d9   : > { %1223 = vmatpush3.bf16.msra.mxu0 %v1284_v52 }
 0x1da   : > { %1224 = vmatprep.subr.bf16.mxu0 %v1285_v3 }
 0x1dd   : > { %1225 = vmatpush3.bf16.msra.mxu0 %v1285_v3 }
 0x1de   : > { %1226 = vmatprep.subr.bf16.mxu0 %v1286_v4 }
 0x1e1   : > { %1227 = vmatpush3.bf16.msra.mxu0 %v1286_v4 }
 0x1e2   : > { %1228 = vmatprep.subr.bf16.mxu0 %v1287_v5 }
 0x1e5   : > { %1229 = vmatpush3.bf16.msra.mxu0 %v1287_v5 }
 0x288   : > { %v1192_v53 = vpop.f32.mrf.mxu0 }
 0x289   : > { %v648_v58 = vadd.f32 %v1192_v53, %v1474_v35 }
 0x28a   : > { %v639_v54 = vpop.f32.mrf.mxu0 }
 0x28b   : > { %v640_v56 = vadd.f32 %v1474_v35, %v639_v54  ;;  %v656_v0 = vmax.f32 %v648_v58, 0.0 }
 0x28c   : > { %v1193_v55 = vpop.f32.mrf.mxu0 }
 0x28d   : > { %v651_v57 = vadd.f32 %v1193_v55, %v1474_v35  ;;  %v654_v62 = vmax.f32 %v640_v56, 0.0 }
 0x28e   : > { %v642_v59 = vpop.f32.mrf.mxu0 }
 0x28f   : > { %v643_v60 = vadd.f32 %v1474_v35, %v642_v59  ;;  %v657_v61 = vmax.f32 %v651_v57, 0.0 }
 0x291   : > { %v655_v63 = vmax.f32 %v643_v60, 0.0  ;;  %v659_v2 = vpack.c.bf16 %v657_v61, %v656_v0 }
 0x293   : > { %v658_v1 = vpack.c.bf16 %v655_v63, %v654_v62 }
 0x295   : > { %1210 = vmatprep.mubr.bf16.mxu1 %v658_v1 }
 0x296   : > { %1211 = vmatmul.mubr.bf16.vlgmr.msra.gmra.mxu1 %v659_v2 }
 0x297   : > { %1235 = vmatpush3.bf16.msra.mxu1 %v1288_v6 }
 0x298   : > { %1236 = vmatprep.subr.bf16.mxu1 %v1289_v7 }
 0x29b   : > { %1237 = vmatpush3.bf16.msra.mxu1 %v1289_v7 }
 0x29c   : > { %1238 = vmatprep.subr.bf16.mxu1 %v1290_v8 }
 0x29f   : > { %1239 = vmatpush3.bf16.msra.mxu1 %v1290_v8 }
 0x2a0   : > { %1240 = vmatprep.subr.bf16.mxu1 %v1291_v9 }
 0x2a3   : > { %1241 = vmatpush3.bf16.msra.mxu1 %v1291_v9 }
 0x2a4   : > { %1242 = vmatprep.subr.bf16.mxu1 %v1292_v10 }
 0x2a7   : > { %1243 = vmatpush3.bf16.msra.mxu1 %v1292_v10 }
 0x2a8   : > { %1244 = vmatprep.subr.bf16.mxu1 %v1293_v25 }
 0x2ab   : > { %1245 = vmatpush3.bf16.msra.mxu1 %v1293_v25 }
 0x2ac   : > { %1246 = vmatprep.subr.bf16.mxu1 %v1294_v26 }
 0x2af   : > { %1247 = vmatpush3.bf16.msra.mxu1 %v1294_v26 }
 0x2b0   : > { %1248 = vmatprep.subr.bf16.mxu1 %v1295_v27 }
 0x2b3   : > { %1249 = vmatpush3.bf16.msra.mxu1 %v1295_v27 }
 0x356   : > { %v1212_v11 = vpop.f32.mrf.mxu1 }
 0x357   : > { %v703_v16 = vadd.f32 %v1212_v11, %v1474_v35 }
 0x358   : > { %v694_v12 = vpop.f32.mrf.mxu1 }
 0x359   : > { %v695_v14 = vadd.f32 %v1474_v35, %v694_v12  ;;  %v711_v22 = vmax.f32 %v703_v16, 0.0 }
 0x35a   : > { %v1213_v13 = vpop.f32.mrf.mxu1 }
 0x35b   : > { %v706_v15 = vadd.f32 %v1213_v13, %v1474_v35  ;;  %v709_v20 = vmax.f32 %v695_v14, 0.0 }
 0x35c   : > { %v697_v17 = vpop.f32.mrf.mxu1 }
 0x35d   : > { %v698_v18 = vadd.f32 %v1474_v35, %v697_v17  ;;  %v712_v19 = vmax.f32 %v706_v15, 0.0 }
 0x35f   : > { %v710_v21 = vmax.f32 %v698_v18, 0.0  ;;  %v714_v24 = vpack.c.bf16 %v712_v19, %v711_v22 }
 0x361   : > { %v713_v23 = vpack.c.bf16 %v710_v21, %v709_v20 }
 0x363   : > { %1230 = vmatprep.mubr.bf16.mxu0 %v713_v23 }
 0x364   : > { %1231 = vmatmul.mubr.bf16.vlgmr.msra.gmra.mxu0 %v714_v24 }
 0x424   : > { %v1232_v28 = vpop.f32.mrf.mxu0 }
 0x425   : > { %v829_v34 = vadd.f32 %v1232_v28, %v1054_v30 }
 0x426   : > { %v820_v29 = vpop.f32.mrf.mxu0 }
 0x427   : > { %v821_v32 = vadd.f32 %v1054_v30, %v820_v29  ;;  %v837_v40 = vmax.f32 %v829_v34, 0.0 }
 0x428   : > { %v1233_v31 = vpop.f32.mrf.mxu0 }
 0x429   : > { %v832_v33 = vadd.f32 %v1233_v31, %v1054_v30  ;;  %v835_v38 = vmax.f32 %v821_v32, 0.0 }
 0x42a   : > { %v823_v35 = vpop.f32.mrf.mxu0 }
 0x42b   : > { %v824_v36 = vadd.f32 %v1054_v30, %v823_v35  ;;  %v838_v37 = vmax.f32 %v832_v33, 0.0 }
 0x42d   : > { %v836_v39 = vmax.f32 %v824_v36, 0.0  ;;  %v840_v42 = vpack.c.bf16 %v838_v37, %v837_v40 }
 0x42f   : > { %v839_v41 = vpack.c.bf16 %v836_v39, %v835_v38 }
 0x431   : > { %1250 = vmatprep.mubr.bf16.mxu1 %v839_v41 }
 0x432   : > { %1251 = vmatmul.mubr.bf16.vlgmr.msra.gmra.mxu1 %v840_v42 }
 0x4f2   : > { %v1252_v43 = vpop.f32.mrf.mxu1 }
 0x4f3   : > { %v955_v48 = vadd.f32 %v1252_v43, %v1063_v44 }
 0x4f4   : > { %v946_v45 = vpop.f32.mrf.mxu1 }
 0x4f5   : > { %v947_v46 = vadd.f32 %v1063_v44, %v946_v45 }
 0x4f6   : > { %v1253_v47 = vpop.f32.mrf.mxu1 }
 0x4f7   : > { %1296 = vtanh.f32 %v947_v46  ;;  %v958_v50 = vadd.f32 %v1253_v47, %v1063_v44 }
 0x4f8   : > { %v949_v49 = vpop.f32.mrf.mxu1 }
 0x4f9   : > { %v950_v51 = vadd.f32 %v1063_v44, %v949_v49 }
 0x4fb   : > { %1298 = vtanh.f32 %v950_v51 }
 0x4fc   : > { %1300 = vtanh.f32 %v955_v48 }
 0x4fd   : > { %1302 = vtanh.f32 %v958_v50 }
 0x504   : > { %v1297_v52 = vpop.eup %1296 }
 0x505   : > { %965 = vst [vmem:[%s334_s15] sm:$0xff] %v1297_v52 }
 0x508   : > { %v1299_v53 = vpop.eup %1298 }
 0x509   : > { %v1301_v54 = vpop.eup %1300  ;;  %966 = vst [vmem:[%s334_s15 + $0x8] sm:$0xff] %v1299_v53 }
 0x50a   : > { %v1303_v55 = vpop.eup %1302  ;;  %967 = vst [vmem:[%s334_s15 + $0x10] sm:$0xff] %v1301_v54 }
 0x50b   : > { %968 = vst [vmem:[%s334_s15 + $0x18] sm:$0xff] %v1303_v55 }
 0x50c PF: > { %s19_s30 = sadd.s32 1, %s1310_s30  }
 0x50d   : > { %p16_p4 = scmp.ge.s32.totalorder %s19_s30, 4  }
 0x50f   :  { %18 = sbr.rel (!%p16_p4) target bundleno = 1 (0x1), region = 86 }

</bundles_post_ra>
